<compile_context>
chip_gen: v5e
topology: v5e:2x2
jax: 0.10.0
libtpu: 0.0.40
codegen_flags: <defaults>
</compile_context>

<pallas_src>
import jax
import jax.numpy as jnp
from jax.experimental import pallas as pl
from jax.experimental.pallas import tpu as pltpu


def _round_up(x: int, n: int) -> int:
    return ((x + n - 1) // n) * n


def _choose_tm(m: int, in_dim: int, emb_p: int, xbytes: int, obytes: int,
               *, vmem_budget: int = 24 << 20, tm_cap: int = 4096) -> int:
    """Largest 8-aligned row tile whose double-buffered tiles fit the VMEM budget."""
    w_bytes = in_dim * emb_p * xbytes            # weight is VMEM-resident (single copy)
    avail = max(vmem_budget - w_bytes, 1 << 20)
    per_row = 2 * (in_dim * xbytes + emb_p * obytes)   # double-buffered x + out tiles
    tm = max(8, min(tm_cap, avail // per_row))
    tm = (tm // 8) * 8
    tm = min(tm, _round_up(m, 8))
    return max(tm, 8)


def _multihot_embed_kernel(x_ref, w_ref, o_ref):
    # x_ref: (tm, in_dim), w_ref: (in_dim, emb_p), o_ref: (tm, emb_p)
    o_ref[...] = jnp.dot(
        x_ref[...], w_ref[...], preferred_element_type=jnp.float32
    ).astype(o_ref.dtype)


def multihot_embedder(
    x_values: jax.Array,
    weight_t: jax.Array,
    *,
    compute_dtype=jnp.float32,
) -> jax.Array:
    """Pallas equivalent of MultiHotEmbedder.forward (use_emb=True).

    x_values: (batch, seq, in_dim) float32
    weight_t: (in_dim, emb_dim) float32 -- transpose of torch Linear.weight
    returns:  (batch, seq, emb_dim) float32
    """
    b, s, in_dim = x_values.shape
    in_dim_w, emb_dim = weight_t.shape
    assert in_dim == in_dim_w

    out_dtype = x_values.dtype
    m = b * s

    # Lane-dense output: pad emb_dim to a multiple of 128 (with zero weight
    # columns) so output stores are full vst's rather than masked partial stores.
    emb_p = _round_up(emb_dim, 128)

    xbytes = jnp.dtype(compute_dtype).itemsize
    obytes = jnp.dtype(out_dtype).itemsize
    tm = _choose_tm(m, in_dim, emb_p, xbytes, obytes)
    m_pad = _round_up(m, tm)

    x2d = x_values.reshape(m, in_dim).astype(compute_dtype)
    if m_pad != m:
        x2d = jnp.pad(x2d, ((0, m_pad - m), (0, 0)))

    w = weight_t.astype(compute_dtype)
    if emb_p != emb_dim:
        w = jnp.pad(w, ((0, 0), (0, emb_p - emb_dim)))

    grid = (m_pad // tm,)

    cost = pl.CostEstimate(
        flops=2 * m_pad * in_dim * emb_p,
        transcendentals=0,
        bytes_accessed=(
            m_pad * in_dim * xbytes      # x
            + in_dim * emb_p * xbytes    # weight (resident, read once)
            + m_pad * emb_p * obytes     # output
        ),
    )

    out2d = pl.pallas_call(
        _multihot_embed_kernel,
        out_shape=jax.ShapeDtypeStruct((m_pad, emb_p), out_dtype),
        grid_spec=pltpu.PrefetchScalarGridSpec(
            num_scalar_prefetch=0,
            grid=grid,
            in_specs=[
                pl.BlockSpec((tm, in_dim), lambda i: (i, 0)),
                pl.BlockSpec((in_dim, emb_p), lambda i: (0, 0)),  # weight resident
            ],
            out_specs=pl.BlockSpec((tm, emb_p), lambda i: (i, 0)),
        ),
        compiler_params=pltpu.CompilerParams(
            # Rows are independent -> megacore-shard on v7x; neutral on v5e/v6e.
            dimension_semantics=("parallel",),
            vmem_limit_bytes=32 * 1024 * 1024,
        ),
        cost_estimate=cost,
    )(x2d, w)

    return out2d[:m, :emb_dim].reshape(b, s, emb_dim)


def multihot_embedder_no_emb(x_values: jax.Array) -> jax.Array:
    """MultiHotEmbedder.forward when use_emb=False: identity passthrough."""
    return x_values


if __name__ == "__main__":
    # Small shapes consistent with the module: batch=2, seq=8, in_dim=32, emb_dim=50
    batch, seq, in_dim, emb_dim = 2, 8, 32, 50

    key = jax.random.PRNGKey(0)
    k_x, k_w = jax.random.split(key)

    # Multi-hot style input (0/1 floats), padded sequences.
    x_values = (jax.random.uniform(k_x, (batch, seq, in_dim)) < 0.3).astype(jnp.float32)

    # Deterministic "Linear(in_dim, emb_dim, bias=False)" weight, stored
    # already transposed: (in_dim, emb_dim).
    scale = (2.0 / (in_dim + emb_dim)) ** 0.5
    weight_t = scale * jax.random.normal(k_w, (in_dim, emb_dim), dtype=jnp.float32)

    # Default (exact f32) path matches the original Linear numerics.
    out = multihot_embedder(x_values, weight_t)
    out = jax.block_until_ready(out)
    assert out.shape == (batch, seq, emb_dim)
    ref_f32 = jnp.einsum("bsi,ie->bse", x_values, weight_t)
    assert jnp.allclose(out, ref_f32, atol=1e-5, rtol=1e-5)

    # bf16 fast path: x is 0/1 -> exact cast; weight rounded to bf16, f32 accumulation.
    out_bf16 = multihot_embedder(x_values, weight_t, compute_dtype=jnp.bfloat16)
    out_bf16 = jax.block_until_ready(out_bf16)
    w_bf16_ref = weight_t.astype(jnp.bfloat16).astype(jnp.float32)
    ref_bf16 = jnp.einsum("bsi,ie->bse", x_values, w_bf16_ref)
    assert jnp.allclose(out_bf16, ref_bf16, atol=1e-4, rtol=1e-4)

    print("KERNEL_OK")
</pallas_src>

<mosaic_0001>
module attributes {stable_mosaic.version = 11 : i64} {
  func.func @_multihot_embed_kernel(%arg0: i32, %arg1: memref<16x32xf32, #tpu.memory_space<vmem>>, %arg2: memref<32x128xf32, #tpu.memory_space<vmem>>, %arg3: memref<16x128xf32, #tpu.memory_space<vmem>>) attributes {dimension_semantics = [#tpu.dimension_semantics<parallel>], iteration_bounds = array<i64: 1>, scalar_prefetch = 0 : i64, scratch_operands = 0 : i64, tpu.core_type = #tpu.core_type<tc>, window_params = [{transform_indices = @transform_0, window_bounds = array<i64: 16, 32>}, {pipeline_mode = #tpu.pipeline_mode<synchronous>, transform_indices = @transform_1, window_bounds = array<i64: 32, 128>}, {transform_indices = @transform_2, window_bounds = array<i64: 16, 128>}]} {
    %c0 = arith.constant 0 : index
    %c0_0 = arith.constant 0 : index
    %0 = vector.load %arg1[%c0, %c0_0] : memref<16x32xf32, #tpu.memory_space<vmem>>, vector<16x32xf32>
    %c0_1 = arith.constant 0 : index
    %c0_2 = arith.constant 0 : index
    %1 = vector.load %arg2[%c0_1, %c0_2] : memref<32x128xf32, #tpu.memory_space<vmem>>, vector<32x128xf32>
    %cst = arith.constant dense<0.000000e+00> : vector<16x128xf32>
    %2 = tpu.matmul %0, %1, %cst {dimension_numbers = #tpu.dot_dimension_numbers<[1], [0], [0], [1], [0, 0, 1, 1], [], []>} : vector<16x32xf32>, vector<32x128xf32>, vector<16x128xf32> -> vector<16x128xf32>
    %c0_3 = arith.constant 0 : index
    %c0_4 = arith.constant 0 : index
    %3 = vector.load %arg3[%c0_3, %c0_4] : memref<16x128xf32, #tpu.memory_space<vmem>>, vector<16x128xf32>
    tpu.vector_store %arg3[%c0_3, %c0_4], %2 {strides = array<i32>} : memref<16x128xf32, #tpu.memory_space<vmem>>, vector<16x128xf32>,
    return
  }
  func.func @transform_0(%arg0: i32) -> (i32, i32) {
    %c0_i32 = arith.constant 0 : i32
    %c0_i32_0 = arith.constant 0 : i32
    return %arg0, %c0_i32 : i32, i32
  }
  func.func @transform_1(%arg0: i32) -> (i32, i32) {
    %c0_i32 = arith.constant 0 : i32
    %c0_i32_0 = arith.constant 0 : i32
    %c0_i32_1 = arith.constant 0 : i32
    return %c0_i32, %c0_i32_0 : i32, i32
  }
  func.func @transform_2(%arg0: i32) -> (i32, i32) {
    %c0_i32 = arith.constant 0 : i32
    %c0_i32_0 = arith.constant 0 : i32
    return %arg0, %c0_i32 : i32, i32
  }
}

</mosaic_0001>

<bundles_post_ra>
// kernel: tpu_custom_call.1
= control target key start
LH: loop header
LB: loop body
LE: loop exit
PB: predicated region body
PF: predicated region fallthrough
CT: control target
= control target key end

     0   :  { %7 = vsyncpa [#allocation3], 0  ;;  %s229_s0 = inlined_call_operand.hbm [shape: f32[16,32], index: 0, kind: input, shape index: {}]   ;;  %s230_s1 = inlined_call_operand.hbm [shape: f32[32,128], index: 1, kind: input, shape index: {}]   ;;  %s231_s2 = inlined_call_operand.hbm [shape: f32[16,128], index: 2, kind: output, shape index: {}]  }
   0x1   :  { %8 = vsyncpa [#allocation6], 0 }
   0x2   :  { %9 = vsyncpa [#allocation4], 0  ;;  %s14_s11 = sshll.u32 %s229_s0, 4  ;;  %s191_s12 = smov [#allocation2]   ;;  %s15_s11 = int_to_ptr.hbm [resolvable:$true] %s14_s11 }
   0x3   :  { %s16_s13 = sshll.u32 %s191_s12, 4  ;;  %s27_s16 = sshll.u32 %s230_s1, 4  ;;  %s17_s13 = int_to_ptr.vmem [resolvable:$true] %s16_s13  ;;  %s28_s16 = int_to_ptr.hbm [resolvable:$true] %s27_s16 }
   0x4   :  { %s192_s17 = smov 128   ;;  %s193_s18 = smov 8  }
   0x5   :  { %22 = dma.hbm_to_vmem [thread:$0]  %s15_s11, 256, %s17_s13, [#allocation3], %s192_s17, %s192_s17, %s193_s18  }
   0x6   :  { %s194_s19 = smov [#allocation5]  }
   0x7   :  { %s29_s20 = sshll.u32 %s194_s19, 4  ;;  %s30_s20 = int_to_ptr.vmem [resolvable:$true] %s29_s20 }
   0x8   :  { %35 = dma.hbm_to_vmem [thread:$0]  %s28_s16, 512, %s30_s20, [#allocation6], %s192_s17, %s192_s17, %s193_s18  }
   0x9   :  { %185 = dma.done.wait [#allocation3], 256  }
   0xa   :  { %186 = vsyncadd [#allocation3], 4294967040 }
   0xb   :  { %187 = dma.done.wait [#allocation6], 512  }
   0xc   :  { %188 = vsyncadd [#allocation6], 4294966784  ;;  %v49_v0 = vld [vmem:[#allocation5 + $0x18] sm:$0xff]  ;;  %v48_v1 = vld [vmem:[#allocation5 + $0x10] sm:$0xff]  ;;  %vm50_vm0 = vcmask 261120   ;;  %s195_s0 = smov [#allocation7]  }
   0xd   :  { %69 = vmatpush.msra.mxu0 %v49_v0  ;;  %104 = vmatpush.msra.mxu1 %v49_v0  ;;  %v47_v2 = vld [vmem:[#allocation5 + $0x8] sm:$0xff]  ;;  %v46_v3 = vld [vmem:[#allocation5] sm:$0xff]  ;;  %v44_v4 = vld [vmem:[#allocation2] sm:$0xff]  ;;  %s86_s1 = sshll.u32 %s195_s0, 4  ;;  %s88_s23 = sshll.u32 %s231_s2, 4  ;;  %s87_s1 = int_to_ptr.vmem [resolvable:$true] %s86_s1  ;;  %s89_s23 = int_to_ptr.hbm [resolvable:$true] %s88_s23 }
   0xe   :  { %v45_v5 = vld [vmem:[#allocation2 + $0x8] sm:$0xff] }
   0xf   :  { %70 = vmatpush.msra.mxu0 %v48_v1  ;;  %105 = vmatpush.msra.mxu1 %v48_v1 }
  0x11   :  { %71 = vmatpush.msra.mxu0 %v47_v2  ;;  %106 = vmatpush.msra.mxu1 %v47_v2 }
  0x13   :  { %72 = vmatpush.msra.mxu0 %v46_v3  ;;  %107 = vmatpush.msra.mxu1 %v46_v3 }
  0x14   :  { %102 = vmatmul.msk.f32.vlgmr.msra.gmra.mxu0 %vm50_vm0, %v44_v4  ;;  %103 = vmatmul.msk.f32.vlgmr.msra.gmra.mxu1 %vm50_vm0, %v45_v5 }
  0x91   :  { %v74_v6 = vpop.f32.mrf.mxu0  ;;  %v77_v7 = vpop.f32.mrf.mxu1 }
  0x92   :  { %80 = vst [vmem:[#allocation7] sm:$0xff] %v74_v6 }
  0x93   :  { %81 = vst [vmem:[#allocation7 + $0x8] sm:$0xff] %v77_v7 }
  0x94   :  { %94 = dma.vmem_to_hbm [thread:$0]  %s87_s1, 256, %s89_s23, [#allocation4], %s192_s17, %s192_s17, %s193_s18  }
  0x95   :  { %189 = dma.done.wait [#allocation4], 256  }
  0x96   :  { %190 = vsyncadd [#allocation4], 4294967040 }
  0x97   :  { %99 = vsyncpa [#allocation3], 1 }
  0x98   :  { %100 = vsyncpa [#allocation6], 1 }
  0x99   :  { %101 = vsyncpa [#allocation4], 1 }

</bundles_post_ra>
